<compile_context>
chip_gen: v5e
topology: v5e:2x2
jax: 0.10.0
libtpu: 0.0.40
codegen_flags: <defaults>
</compile_context>

<pallas_src>
import jax
import jax.numpy as jnp
import numpy as np
from jax.experimental import pallas as pl
from jax.experimental.pallas import tpu as pltpu


def complex_conv2d_pallas(x, wr, wi, br, bi, *, kernel_size, stride=(1, 1),
                          padding=(0, 0), causal=True, dilation=1):
    """x: [B, C, D, T], C = 2*Cin (first half real, second half imag)."""
    B, C, D, T = x.shape
    assert C % 2 == 0
    Cin = C // 2
    Cout = wr.shape[0]
    KH, KW = kernel_size
    SD, ST = stride
    PD, PT = padding
    assert (SD, ST) == (1, 1), "TODO(synk): only stride=(1,1) (module default)"
    orig_dtype = x.dtype

    # ---- module's forward-path padding (plain-JAX glue on the raw 1x input) --
    if PT != 0 and causal:
        x = jnp.pad(x, ((0, 0), (0, 0), (0, 0), (PT, 0)))      # causal: left only
    else:
        x = jnp.pad(x, ((0, 0), (0, 0), (0, 0), (PT, PT)))
    x = jnp.pad(x, ((0, 0), (0, 0), (PD, PD), (0, 0)))          # conv's D padding

    Dp, Tp = x.shape[2], x.shape[3]
    Dout = Dp - dilation * (KH - 1)
    Tout = Tp - dilation * (KW - 1)
    Cin2, Cout2 = 2 * Cin, 2 * Cout
    Lout = Dout * Tp                       # over-computed columns, cropped later
    extra = (KW - 1) * dilation            # tail pad so every window fits
    Lx = Dp * Tp + extra

    # bf16 BEFORE the kernel: the input is the only large array -> halve its DMA.
    xf = x.astype(jnp.bfloat16).reshape(B, Cin2, Dp * Tp)
    if extra:
        xf = jnp.pad(xf, ((0, 0), (0, 0), (0, extra)))          # (B, 2Cin, Lx)

    # ---- stacked complex weight per tap: (KH*KW, 2Cout, 2Cin), kept f32 ----
    top = jnp.concatenate([wr, -wi], axis=1)                    # real-output rows
    bot = jnp.concatenate([wi, wr], axis=1)                     # imag-output rows
    wcat = jnp.concatenate([top, bot], axis=0)                  # (2Cout, 2Cin, KH, KW)
    wk = wcat.transpose(2, 3, 0, 1).reshape(KH * KW, Cout2, Cin2).astype(jnp.float32)

    # pre-combined bias: real rows get (br - bi), imag rows get (br + bi)
    bc = jnp.concatenate([br - bi, br + bi]).reshape(Cout2, 1).astype(jnp.float32)

    # static flat offsets of each (kh, kw) tap inside the flattened image
    offsets = tuple(kh * dilation * Tp + kw * dilation
                    for kh in range(KH) for kw in range(KW))

    def kernel(x_ref, w_ref, b_ref, o_ref):
        # whole padded image for this batch, promoted to f32 once (VPU, tiny)
        xv = x_ref[0].astype(jnp.float32)                        # (2Cin, Lx)
        acc = jnp.zeros((Cout2, Lout), jnp.float32)
        for k, off in enumerate(offsets):                        # static unroll, KH*KW taps
            acc = acc + jnp.dot(w_ref[k], xv[:, off:off + Lout],
                                preferred_element_type=jnp.float32)
        o_ref[0] = (acc + b_ref[...]).astype(o_ref.dtype)        # f32 bias add

    out_flat = pl.pallas_call(
        kernel,
        out_shape=jax.ShapeDtypeStruct((B, Cout2, Lout), jnp.float32),
        grid_spec=pltpu.PrefetchScalarGridSpec(
            num_scalar_prefetch=0,
            grid=(B,),
            in_specs=[pl.BlockSpec((1, Cin2, Lx), lambda b: (b, 0, 0)),       # image
                      pl.BlockSpec((KH * KW, Cout2, Cin2), lambda b: (0, 0, 0)),  # W (resident)
                      pl.BlockSpec((Cout2, 1), lambda b: (0, 0))],            # bias (resident)
            out_specs=pl.BlockSpec((1, Cout2, Lout), lambda b: (b, 0, 0))),   # lane-dense out
        compiler_params=pltpu.CompilerParams(
            dimension_semantics=("parallel",)),
    )(xf, wk, bc)

    # (B, 2Cout, Dout*Tp) -> NCHW, cropping the over-computed (wrapped) columns.
    out = out_flat.reshape(B, Cout2, Dout, Tp)[..., :Tout]
    return out.astype(orig_dtype)


def _reference(x, wr, wi, br, bi, *, kernel_size, stride, padding, causal,
               dilation=1):
    """Pure-JAX f32 reference mirroring the PyTorch forward exactly."""
    PD, PT = padding
    if PT != 0 and causal:
        x = jnp.pad(x, ((0, 0), (0, 0), (0, 0), (PT, 0)))
    else:
        x = jnp.pad(x, ((0, 0), (0, 0), (0, 0), (PT, PT)))
    real, imag = jnp.split(x, 2, axis=1)

    def conv(inp, w, b):
        y = jax.lax.conv_general_dilated(
            inp, w, window_strides=stride,
            padding=((PD, PD), (0, 0)),
            rhs_dilation=(dilation, dilation),
            dimension_numbers=("NCHW", "OIHW", "NCHW"))
        return y + b.reshape(1, -1, 1, 1)

    r2r = conv(real, wr, br)
    i2i = conv(imag, wi, bi)
    r2i = conv(real, wi, bi)
    i2r = conv(imag, wr, br)
    return jnp.concatenate([r2r - i2i, r2i + i2r], axis=1)


if __name__ == "__main__":
    # Module config: in_channels=8 (4 real + 4 imag), out_channels=8,
    # kernel_size=(3,2), stride=(1,1), padding=(1,1), causal=True, complex_axis=1
    in_channels, out_channels = 8, 8
    kernel_size, stride, padding = (3, 2), (1, 1), (1, 1)
    Cin, Cout = in_channels // 2, out_channels // 2
    B, D, T = 2, 16, 16

    key = jax.random.PRNGKey(0)
    kx, kwr, kwi = jax.random.split(key, 3)
    x = jax.random.normal(kx, (B, in_channels, D, T), dtype=jnp.float32)
    # deterministic init matching nn.init.normal_(std=0.05) / constant_(0.0)
    wr = 0.05 * jax.random.normal(kwr, (Cout, Cin, *kernel_size), jnp.float32)
    wi = 0.05 * jax.random.normal(kwi, (Cout, Cin, *kernel_size), jnp.float32)
    br = jnp.zeros((Cout,), jnp.float32)
    bi = jnp.zeros((Cout,), jnp.float32)

    out = complex_conv2d_pallas(x, wr, wi, br, bi,
                                kernel_size=kernel_size, stride=stride,
                                padding=padding, causal=True)
    out = jax.block_until_ready(out)

    ref = _reference(x, wr, wi, br, bi, kernel_size=kernel_size,
                     stride=stride, padding=padding, causal=True)
    # Input is bf16 on the wire (weights/bias/accumulation stay f32), so this
    # is at least as accurate as the previous all-bf16-operand version.
    np.testing.assert_allclose(np.asarray(out), np.asarray(ref),
                               rtol=5e-2, atol=1e-2)
    print("KERNEL_OK")
</pallas_src>

<mosaic_0001>
module attributes {stable_mosaic.version = 11 : i64} {
  func.func @kernel(%arg0: i32, %arg1: memref<1x8x307xbf16, #tpu.memory_space<vmem>>, %arg2: memref<6x8x8xf32, #tpu.memory_space<vmem>>, %arg3: memref<8x1xf32, #tpu.memory_space<vmem>>, %arg4: memref<1x8x272xf32, #tpu.memory_space<vmem>>) attributes {dimension_semantics = [#tpu.dimension_semantics<parallel>], iteration_bounds = array<i64: 2>, scalar_prefetch = 0 : i64, scratch_operands = 0 : i64, tpu.core_type = #tpu.core_type<tc>, window_params = [{transform_indices = @transform_0, window_bounds = array<i64: 1, 8, 307>}, {pipeline_mode = #tpu.pipeline_mode<synchronous>, transform_indices = @transform_1, window_bounds = array<i64: 6, 8, 8>}, {pipeline_mode = #tpu.pipeline_mode<synchronous>, transform_indices = @transform_2, window_bounds = array<i64: 8, 1>}, {transform_indices = @transform_3, window_bounds = array<i64: 1, 8, 272>}]} {
    %c0 = arith.constant 0 : index
    %c0_0 = arith.constant 0 : index
    %c0_1 = arith.constant 0 : index
    %0 = vector.load %arg1[%c0, %c0_0, %c0_1] : memref<1x8x307xbf16, #tpu.memory_space<vmem>>, vector<1x8x307xbf16>
    %1 = vector.shape_cast %0 : vector<1x8x307xbf16> to vector<8x307xbf16>
    %2 = arith.extf %1 : vector<8x307xbf16> to vector<8x307xf32>
    %cst = arith.constant 0.000000e+00 : f32
    %3 = vector.broadcast %cst : f32 to vector<8x272xf32>
    %c0_2 = arith.constant 0 : index
    %c0_3 = arith.constant 0 : index
    %c0_4 = arith.constant 0 : index
    %4 = vector.load %arg2[%c0_2, %c0_3, %c0_4] : memref<6x8x8xf32, #tpu.memory_space<vmem>>, vector<1x8x8xf32>
    %5 = vector.shape_cast %4 : vector<1x8x8xf32> to vector<8x8xf32>
    %6 = vector.extract_strided_slice %2 {offsets = [0, 0], sizes = [8, 272], strides = [1, 1]} : vector<8x307xf32> to vector<8x272xf32>
    %cst_5 = arith.constant dense<0.000000e+00> : vector<8x272xf32>
    %7 = tpu.matmul %5, %6, %cst_5 {dimension_numbers = #tpu.dot_dimension_numbers<[1], [0], [0], [1], [0, 0, 1, 1], [], []>} : vector<8x8xf32>, vector<8x272xf32>, vector<8x272xf32> -> vector<8x272xf32>
    %8 = arith.addf %3, %7 : vector<8x272xf32>
    %c1 = arith.constant 1 : index
    %c0_6 = arith.constant 0 : index
    %c0_7 = arith.constant 0 : index
    %9 = vector.load %arg2[%c1, %c0_6, %c0_7] : memref<6x8x8xf32, #tpu.memory_space<vmem>>, vector<1x8x8xf32>
    %10 = vector.shape_cast %9 : vector<1x8x8xf32> to vector<8x8xf32>
    %11 = vector.extract_strided_slice %2 {offsets = [0, 1], sizes = [8, 272], strides = [1, 1]} : vector<8x307xf32> to vector<8x272xf32>
    %cst_8 = arith.constant dense<0.000000e+00> : vector<8x272xf32>
    %12 = tpu.matmul %10, %11, %cst_8 {dimension_numbers = #tpu.dot_dimension_numbers<[1], [0], [0], [1], [0, 0, 1, 1], [], []>} : vector<8x8xf32>, vector<8x272xf32>, vector<8x272xf32> -> vector<8x272xf32>
    %13 = arith.addf %8, %12 : vector<8x272xf32>
    %c2 = arith.constant 2 : index
    %c0_9 = arith.constant 0 : index
    %c0_10 = arith.constant 0 : index
    %14 = vector.load %arg2[%c2, %c0_9, %c0_10] : memref<6x8x8xf32, #tpu.memory_space<vmem>>, vector<1x8x8xf32>
    %15 = vector.shape_cast %14 : vector<1x8x8xf32> to vector<8x8xf32>
    %16 = vector.extract_strided_slice %2 {offsets = [0, 17], sizes = [8, 272], strides = [1, 1]} : vector<8x307xf32> to vector<8x272xf32>
    %cst_11 = arith.constant dense<0.000000e+00> : vector<8x272xf32>
    %17 = tpu.matmul %15, %16, %cst_11 {dimension_numbers = #tpu.dot_dimension_numbers<[1], [0], [0], [1], [0, 0, 1, 1], [], []>} : vector<8x8xf32>, vector<8x272xf32>, vector<8x272xf32> -> vector<8x272xf32>
    %18 = arith.addf %13, %17 : vector<8x272xf32>
    %c3 = arith.constant 3 : index
    %c0_12 = arith.constant 0 : index
    %c0_13 = arith.constant 0 : index
    %19 = vector.load %arg2[%c3, %c0_12, %c0_13] : memref<6x8x8xf32, #tpu.memory_space<vmem>>, vector<1x8x8xf32>
    %20 = vector.shape_cast %19 : vector<1x8x8xf32> to vector<8x8xf32>
    %21 = vector.extract_strided_slice %2 {offsets = [0, 18], sizes = [8, 272], strides = [1, 1]} : vector<8x307xf32> to vector<8x272xf32>
    %cst_14 = arith.constant dense<0.000000e+00> : vector<8x272xf32>
    %22 = tpu.matmul %20, %21, %cst_14 {dimension_numbers = #tpu.dot_dimension_numbers<[1], [0], [0], [1], [0, 0, 1, 1], [], []>} : vector<8x8xf32>, vector<8x272xf32>, vector<8x272xf32> -> vector<8x272xf32>
    %23 = arith.addf %18, %22 : vector<8x272xf32>
    %c4 = arith.constant 4 : index
    %c0_15 = arith.constant 0 : index
    %c0_16 = arith.constant 0 : index
    %24 = vector.load %arg2[%c4, %c0_15, %c0_16] : memref<6x8x8xf32, #tpu.memory_space<vmem>>, vector<1x8x8xf32>
    %25 = vector.shape_cast %24 : vector<1x8x8xf32> to vector<8x8xf32>
    %26 = vector.extract_strided_slice %2 {offsets = [0, 34], sizes = [8, 272], strides = [1, 1]} : vector<8x307xf32> to vector<8x272xf32>
    %cst_17 = arith.constant dense<0.000000e+00> : vector<8x272xf32>
    %27 = tpu.matmul %25, %26, %cst_17 {dimension_numbers = #tpu.dot_dimension_numbers<[1], [0], [0], [1], [0, 0, 1, 1], [], []>} : vector<8x8xf32>, vector<8x272xf32>, vector<8x272xf32> -> vector<8x272xf32>
    %28 = arith.addf %23, %27 : vector<8x272xf32>
    %c5 = arith.constant 5 : index
    %c0_18 = arith.constant 0 : index
    %c0_19 = arith.constant 0 : index
    %29 = vector.load %arg2[%c5, %c0_18, %c0_19] : memref<6x8x8xf32, #tpu.memory_space<vmem>>, vector<1x8x8xf32>
    %30 = vector.shape_cast %29 : vector<1x8x8xf32> to vector<8x8xf32>
    %31 = vector.extract_strided_slice %2 {offsets = [0, 35], sizes = [8, 272], strides = [1, 1]} : vector<8x307xf32> to vector<8x272xf32>
    %cst_20 = arith.constant dense<0.000000e+00> : vector<8x272xf32>
    %32 = tpu.matmul %30, %31, %cst_20 {dimension_numbers = #tpu.dot_dimension_numbers<[1], [0], [0], [1], [0, 0, 1, 1], [], []>} : vector<8x8xf32>, vector<8x272xf32>, vector<8x272xf32> -> vector<8x272xf32>
    %33 = arith.addf %28, %32 : vector<8x272xf32>
    %c0_21 = arith.constant 0 : index
    %c0_22 = arith.constant 0 : index
    %34 = vector.load %arg3[%c0_21, %c0_22] : memref<8x1xf32, #tpu.memory_space<vmem>>, vector<8x1xf32>
    %35 = vector.broadcast %34 : vector<8x1xf32> to vector<8x272xf32>
    %36 = arith.addf %33, %35 : vector<8x272xf32>
    %c0_23 = arith.constant 0 : index
    %c0_24 = arith.constant 0 : index
    %c0_25 = arith.constant 0 : index
    %37 = vector.load %arg4[%c0_23, %c0_24, %c0_25] : memref<1x8x272xf32, #tpu.memory_space<vmem>>, vector<1x8x272xf32>
    %38 = vector.shape_cast %37 : vector<1x8x272xf32> to vector<8x272xf32>
    %39 = vector.shape_cast %36 : vector<8x272xf32> to vector<1x8x272xf32>
    tpu.vector_store %arg4[%c0_23, %c0_24, %c0_25], %39 {strides = array<i32>} : memref<1x8x272xf32, #tpu.memory_space<vmem>>, vector<1x8x272xf32>,
    return
  }
  func.func @transform_0(%arg0: i32) -> (i32, i32, i32) {
    %c0_i32 = arith.constant 0 : i32
    %c0_i32_0 = arith.constant 0 : i32
    %c0_i32_1 = arith.constant 0 : i32
    return %arg0, %c0_i32, %c0_i32_0 : i32, i32, i32
  }
  func.func @transform_1(%arg0: i32) -> (i32, i32, i32) {
    %c0_i32 = arith.constant 0 : i32
    %c0_i32_0 = arith.constant 0 : i32
    %c0_i32_1 = arith.constant 0 : i32
    %c0_i32_2 = arith.constant 0 : i32
    return %c0_i32, %c0_i32_0, %c0_i32_1 : i32, i32, i32
  }
  func.func @transform_2(%arg0: i32) -> (i32, i32) {
    %c0_i32 = arith.constant 0 : i32
    %c0_i32_0 = arith.constant 0 : i32
    %c0_i32_1 = arith.constant 0 : i32
    return %c0_i32, %c0_i32_0 : i32, i32
  }
  func.func @transform_3(%arg0: i32) -> (i32, i32, i32) {
    %c0_i32 = arith.constant 0 : i32
    %c0_i32_0 = arith.constant 0 : i32
    %c0_i32_1 = arith.constant 0 : i32
    return %arg0, %c0_i32, %c0_i32_0 : i32, i32, i32
  }
}

</mosaic_0001>

<bundles_post_ra>
// kernel: tpu_custom_call.1
= control target key start
LH: loop header
LB: loop body
LE: loop exit
PB: predicated region body
PF: predicated region fallthrough
CT: control target
= control target key end

     0   :  { %8 = vsyncpa [#allocation3], 0  ;;  %s1239_s0 = inlined_call_operand.hbm [shape: bf16[2,8,307], index: 0, kind: input, shape index: {}]   ;;  %s1240_s1 = inlined_call_operand.hbm [shape: f32[6,8,8], index: 1, kind: input, shape index: {}]   ;;  %s1241_s2 = inlined_call_operand.vmem [shape: f32[8,1], index: 2, kind: input, shape index: {}]   ;;  %s1242_s3 = inlined_call_operand.hbm [shape: f32[2,8,272], index: 3, kind: output, shape index: {}]  }
   0x1   :  { %10 = vsyncpa [#allocation3 + $0x1], 0 }
   0x2   :  { %11 = vsyncpa [#allocation6], 0 }
   0x3   :  { %12 = vsyncpa [#allocation4], 0 }
   0x4   :  { %14 = vsyncpa [#allocation4 + $0x1], 0  ;;  %s1072_s12 = smov 0   ;;  %s1074_s13 = smov 0  }
   0x5   :  { %s1076_s14 = smov 0   ;;  %s1078_s15 = smov 0  }
   0x6 LB: > { %s130_s18 = sshll.u32 %s1240_s1, 4  ;;  %s1096_s19 = sadd.s32 4294967295, %s1041_s15   ;;  %s1041_s15 = sphi %s1078_s15, %s1252_s15   ;;  %s1037_s14 = sphi %s1076_s14, %s1251_s14   ;;  %s1033_s13 = sphi %s1074_s13, %s1250_s13   ;;  %s1029_s12 = sphi %s1072_s12, %s1249_s12   ;;  %s131_s18 = int_to_ptr.hbm [resolvable:$true] %s130_s18 }
   0x7   : > { %p787_p0 = scmp.ge.s32.totalorder %s1041_s15, 1  ;;  %p41_p1 = scmp.eq.s32.totalorder %s1096_s19, 0 }
   0x8   : > { %p119_p2 = scmp.lt.s32.totalorder %s1041_s15, 3  ;;  %s1043_s21 = smov [#allocation5]  }
   0x9   : > { %s132_s22 = sshll.u32 %s1043_s21, 4  ;;  %s1044_s23 = smov 128   ;;  %s133_s22 = int_to_ptr.vmem [resolvable:$true] %s132_s22 }
   0xa   : > { %p1101_p3 = pnand %p787_p0, %p119_p2  ;;  %s1045_s24 = smov 8  }
   0xb   : > { %s786_s25 = sadd.s32 4294967294, %s1041_s15   ;;  %s1112_s26 = sadd.s32 1, %s1041_s15  }
   0xc   : > { %p827_p4 = pneg %p1101_p3  ;;  %s27_s27 = sadd.s32 1, %s1037_s14 }
   0xd   : > { %s24_s28 = ssub.s32 %s1041_s15, %s1112_s26  ;;  %p34_p7 = scmp.ne.s32.totalorder %s1037_s14, %s1033_s13 }
   0xe   : > { %p828_p6 = pnand %p827_p4, %p41_p1  ;;  %p25_p8 = scmp.eq.s32.totalorder %s24_s28, 0 }
   0xf   : > { %p35_p9 = scmp.eq.s32.totalorder %s1041_s15, 0  ;;  %p40_p10 = scmp.ne.s32.totalorder %s1033_s13, %s1029_s12 }
  0x10   : > { %830 = dma.hbm_to_vmem [thread:$0]  (!%p828_p6), %s131_s18, 768, %s133_s22, [#allocation6], %s1044_s23, %s1044_s23, %s1045_s24  }
  0x11   : > { %p106_p11 = scmp.eq.s32.totalorder %s1096_s19, 1  ;;  %p36_p12 = por %p35_p9, %p34_p7 }
  0x12   : > { %s1124_s29 = scalar_select %p25_p8, %s1037_s14, %s27_s27  }
  0x13   : > { %p1128_p13 = por %p41_p1, %p40_p10  ;;  %p1132_p0 = por %p106_p11, %p34_p7 }
  0x14   : > { %p112_p2 = scmp.eq.s32.totalorder %s786_s25, 1  ;;  %p840_p4 = scmp.lt.s32.totalorder %s1041_s15, 2 }
  0x15   : > { %s149_s5 = sand.u32 1, %s1037_s14   ;;  %s815_s9 = smul.u32 12, %s1041_s15 }
  0x16   : > { %p1138_p6 = por %p112_p2, %p40_p10  ;;  %s814_s7 = smul.u32 12, %s149_s5 }
  0x17   : > { %p1142_p8 = pnand %p840_p4, %p36_p12  ;;  %s158_s16 = scalar_lea.hbm %s1239_s0, %s815_s9 }
  0x18   : > { %s153_s17 = scalar_lea.vmem [#allocation2], %s814_s7  ;;  %s160_s21 = sshll.u32 %s158_s16, 4  ;;  %s161_s21 = int_to_ptr.hbm [resolvable:$true] %s160_s21 }
  0x19   : > { %s162_s18 = sshll.u32 %s153_s17, 4  ;;  %s150_s22 = scalar_lea.sflag [#allocation3], %s149_s5  ;;  %s163_s18 = int_to_ptr.vmem [resolvable:$true] %s162_s18 }
  0x1a   : > { %s941_s23 = sshra.s32 %s161_s21, 4  ;;  %p945_p9 = pneg %p1142_p8  ;;  %s942_s23 = int_to_ptr.hbm [resolvable:$true] %s941_s23 }
  0x1b   : > { %s943_s24 = scalar_lea.hbm %s942_s23, 12  ;;  %s948_s28 = scalar_lea.hbm %s1239_s0, 24 }
  0x1c   : > { %p944_p7 = scmp.ne.s32.totalorder %s942_s23, %s943_s24  ;;  %p949_p12 = scmp.lt.s32.totalorder %s942_s23, %s1239_s0 }
  0x1d   : > { %p950_p2 = scmp.lt.s32.totalorder %s948_s28, %s943_s24 }
  0x1e   : > { %p946_p10 = pnand %p945_p9, %p944_p7 }
  0x1f   : > { %p951_p4 = por %p950_p2, %p949_p12 }
  0x20   : > { %p947_p11 = pneg %p946_p10 }
  0x22   : > { %p952_p5 = pnand %p951_p4, %p947_p11 }
  0x24   : > { %955 = shalt.err (!%p952_p5)
}
  0x25   : > { %834 = dma.hbm_to_vmem [thread:$0]  (!%p1142_p8), %s161_s21, 192, %s163_s18, %s150_s22  }
  0x26   : > { %171 = sbr.rel (%p1101_p3) target bundleno = 342 (0x156), region = 32  ;;  %s1163_s5 = sand.u32 (!%p1101_p3), 1, %s1033_s13  }
  0x27   : > { %s816_s7 = smul.u32 (!%p1101_p3), 12, %s1163_s5  ;;  %s174_s11 = scalar_lea.sflag (!%p1101_p3), [#allocation3], %s1163_s5 }
  0x29   : > { %s177_s16 = scalar_lea.vmem (!%p1101_p3), [#allocation2], %s816_s7 }
  0x2b   : > { %1016 = dma.done.wait (%p1128_p13), %s174_s11, 192  }
  0x2c   : > { %1018 = vsyncadd (%p1128_p13), %s174_s11, 4294967104 }
  0x2d   : > { %1020 = dma.done.wait (%p41_p1), [#allocation6], 768  }
  0x2e   : > { %1022 = vsyncadd (%p41_p1), [#allocation6], 4294966528  ;;  %v206_v0 = vld [vmem:[%s177_s16] sm:$0xff]  ;;  %s1046_s20 = smov 111   ;;  %s1047_s8 = smov 127   ;;  %v1175_v6 = vld [vmem:[#allocation5] sm:$0xff] }
  0x2f   : > { %v208_v1 = vunpack.c.l.bf16 %v206_v0  ;;  %v209_v2 = vunpack.c.h.bf16 %v206_v0  ;;  %v207_v4 = vld [vmem:[%s177_s16 + $0x8] sm:$0xf]  ;;  %s1048_s17 = smov 110   ;;  %s1049_s30 = smov 94   ;;  %vm229_vm0 = vcmask 64512   ;;  %vm223_vm1 = vcmask 1039360  }
  0x30   : > { %v210_v5 = vunpack.c.l.bf16 %v207_v4  ;;  %s1050_s18 = smov 93   ;;  %v213_v13 = vld [vmem:[#allocation5 + $0x8] sm:$0xff]  ;;  %vm364_vm2 = vcmask 908288   ;;  %vm444_vm3 = vcmask 900096   ;;  %v357_v25 = vld [vmem:[#allocation5 + $0x10] sm:$0xff]  ;;  %vm604_vm4 = vcmask 760832  }
  0x31   : > { %v889_v3 = vpack.i.bf16 %v209_v2, %v208_v1  ;;  %311 = vmatpush.msra.mxu3 %v208_v1  ;;  %v676_v31 = vld [vmem:[%s1241_s2] sm:$0xff]  ;;  %v1051_v32 = vmov 0   ;;  %vm524_vm5 = vcmask 769024   ;;  %v437_v37 = vld [vmem:[#allocation5 + $0x18] sm:$0xff]  ;;  %v517_v43 = vld [vmem:[#allocation5 + $0x20] sm:$0xff]  ;;  %s817_s23 = smul.u32 24, %s1163_s5 }
  0x32   : > { %796 = vmatmul.msk.f32.vlgmr.msra.gmra.mxu3 %vm229_vm0, %v1175_v6  ;;  %909 = vset.pattern.permute.xlu1 %v1051_v32  ;;  %v597_v42 = vld [vmem:[#allocation5 + $0x28] sm:$0xff]  ;;  %s818_s24 = smul.u32 24, %s1096_s19  ;;  %vm687_vm6 = vcmask 130048   ;;  %s690_s19 = scalar_lea.sflag [#allocation4], %s1163_s5 }
  0x33   : > { %890 = vrot.lane.b32.xlu1 %v889_v3, %s1046_s20  ;;  %885 = vrot.lane.b32.xlu0 %v889_v3, %s1047_s8  ;;  %s205_s25 = scalar_lea.vmem [#allocation7], %s817_s23 }
  0x34   : > { %895 = vrot.lane.b32.xlu2 %v889_v3, %s1048_s17  ;;  %910 = vset.pattern.permute.xlu0 %v1051_v32  ;;  %s701_s10 = scalar_lea.hbm %s1242_s3, %s818_s24  ;;  %s703_s9 = sshll.u32 %s205_s25, 4  ;;  %s704_s9 = int_to_ptr.vmem [resolvable:$true] %s703_s9 }
  0x35   : > { %s705_s7 = sshll.u32 %s701_s10, 4  ;;  %s706_s7 = int_to_ptr.hbm [resolvable:$true] %s705_s7 }
  0x36   : > { %s985_s11 = sshra.s32 %s706_s7, 4  ;;  %s986_s11 = int_to_ptr.hbm [resolvable:$true] %s985_s11 }
  0x37   : > { %s987_s16 = scalar_lea.hbm %s986_s11, 24  ;;  %p992_p13 = scmp.lt.s32.totalorder %s986_s11, %s1242_s3 }
  0x38   : > { %p988_p1 = scmp.ne.s32.totalorder %s986_s11, %s987_s16 }
  0x3a   : > { %p989_p3 = pnand %p988_p1, %p1132_p0 }
  0x3b   : > { %362 = vrot.lane.b32.xlu1 %v210_v5, %s1046_s20  ;;  %221 = vrot.lane.b32.xlu0 %v210_v5, %s1047_s8 }
  0x3c   : > { %442 = vrot.lane.b32.xlu2 %v210_v5, %s1048_s17  ;;  %p990_p5 = pneg %p989_p3  ;;  %s991_s17 = scalar_lea.hbm %s1242_s3, 48 }
  0x3d   : > { %p993_p8 = scmp.lt.s32.totalorder %s991_s17, %s987_s16 }
  0x3f   : > { %p994_p7 = por %p993_p8, %p992_p13 }
  0x41   : > { %p995_p9 = pnand %p994_p7, %p990_p5 }
  0x43   : > { %900 = vrot.lane.b32.xlu0 %v889_v3, %s1049_s30  ;;  %522 = vrot.lane.b32.xlu1 %v210_v5, %s1049_s30 }
  0x44   : > { %905 = vrot.lane.b32.xlu2 %v889_v3, %s1050_s18 }
  0x4b   : > { %602 = vrot.lane.b32.xlu0 %v210_v5, %s1050_s18  ;;  %679 = vperm.xlu1 %909, %v676_v31  }
  0x8e   : > { %v896_v7 = vpop.permute.xlu2 %895 }
  0x8f   : > { %v898_v18 = vunpack.i.h.bf16 %v896_v7  ;;  %v897_v19 = vunpack.i.l.bf16 %v896_v7 }
  0x91   : > { %v445_v29 = vsel %vm444_vm3, %v897_v19, %v898_v18 }
  0x96   : > { %v443_v8 = vpop.permute.xlu2 %442 }
  0x97   : > { %v446_v28 = vsel %vm444_vm3, %v898_v18, %v443_v8 }
  0x9e   : > { %v906_v17 = vpop.permute.xlu2 %905 }
  0x9f   : > { %v908_v26 = vunpack.i.h.bf16 %v906_v17  ;;  %v907_v27 = vunpack.i.l.bf16 %v906_v17 }
  0xa1   : > { %v605_v30 = vsel %vm604_vm4, %v907_v27, %v908_v26 }
  0xa5   : > { %v891_v9 = vpop.permute.xlu1 %890  ;;  %v886_v10 = vpop.permute.xlu0 %885 }
  0xa6   : > { %v888_v11 = vunpack.i.h.bf16 %v886_v10  ;;  %v887_v12 = vunpack.i.l.bf16 %v886_v10  ;;  %v892_v15 = vunpack.i.l.bf16 %v891_v9  ;;  %v893_v16 = vunpack.i.h.bf16 %v891_v9 }
  0xa8   : > { %v224_v14 = vsel %vm223_vm1, %v887_v12, %v888_v11  ;;  %v365_v22 = vsel %vm364_vm2, %v892_v15, %v893_v16 }
  0xa9   : > { %248 = vmatpush.msra.mxu0 %v224_v14 }
  0xaa   : > { %793 = vmatmul.msk.f32.vlgmr.msra.gmra.mxu0 %vm229_vm0, %v213_v13 }
  0xab   : > { %331 = vmatpush.msrb.mxu0 %v209_v2 }
  0xad   : > { %v363_v20 = vpop.permute.xlu1 %362  ;;  %v222_v21 = vpop.permute.xlu0 %221 }
  0xae   : > { %288 = vmatpush.msra.mxu2 %v222_v21  ;;  %v225_v23 = vsel %vm223_vm1, %v888_v11, %v222_v21  ;;  %v366_v24 = vsel %vm364_vm2, %v893_v16, %v363_v20  ;;  %428 = vmatpush.msra.mxu0 %v363_v20 }
  0xaf   : > { %268 = vmatpush.msra.mxu1 %v225_v23  ;;  %795 = vmatmul.msk.f32.vlgmr.msra.gmra.mxu2 %vm229_vm0, %v213_v13 }
  0xb0   : > { %388 = vmatpush.msrb.mxu2 %v365_v22  ;;  %408 = vmatpush.msrb.mxu3 %v366_v24 }
  0xb1   : > { %794 = vmatmul.msk.f32.vlgmr.msra.gmra.mxu1 %vm229_vm0, %v213_v13  ;;  %800 = vmatmul.msk.f32.vlgmr.msrb.gmra.mxu3 %vm229_vm0, %v357_v25 }
  0xb2   : > { %351 = vmatpush.msrb.mxu1 %v210_v5  ;;  %797 = vmatmul.msk.f32.vlgmr.msrb.gmra.mxu0 %vm229_vm0, %v1175_v6 }
  0xb3   : > { %488 = vmatpush.msra.mxu2 %v446_v28  ;;  %508 = vmatpush.msra.mxu3 %v443_v8 }
  0xb4   : > { %468 = vmatpush.msra.mxu1 %v445_v29 }
  0xb5   : > { %v901_v33 = vpop.permute.xlu0 %900  ;;  %v523_v34 = vpop.permute.xlu1 %522  ;;  %628 = vmatpush.msrb.mxu3 %v605_v30 }
  0xb6   : > { %v903_v35 = vunpack.i.h.bf16 %v901_v33  ;;  %v902_v36 = vunpack.i.l.bf16 %v901_v33  ;;  %v313_v45 = vpop.f32.mrf.mxu3 }
  0xb7   : > { %799 = vmatmul.msk.f32.vlgmr.msrb.gmra.mxu2 %vm229_vm0, %v357_v25 }
  0xb8   : > { %v526_v38 = vsel %vm524_vm5, %v903_v35, %v523_v34  ;;  %588 = vmatpush.msrb.mxu2 %v523_v34  ;;  %v525_v39 = vsel %vm524_vm5, %v902_v36, %v903_v35 }
  0xb9   : > { %798 = vmatmul.msk.f32.vlgmr.msrb.gmra.mxu1 %vm229_vm0, %v1175_v6  ;;  %804 = vmatmul.msk.f32.vlgmr.msra.gmra.mxu3 %vm229_vm0, %v437_v37 }
  0xba   : > { %801 = vmatmul.msk.f32.vlgmr.msra.gmra.mxu0 %vm229_vm0, %v357_v25  ;;  %568 = vmatpush.msrb.mxu1 %v526_v38 }
  0xbb   : > { %548 = vmatpush.msrb.mxu0 %v525_v39 }
  0xbd   : > { %v603_v40 = vpop.permute.xlu0 %602  ;;  %v680_v2 = vpop.permute.xlu1 %679 }
  0xbe   : > { %v606_v41 = vsel %vm604_vm4, %v908_v26, %v603_v40 }
  0xbf   : > { %803 = vmatmul.msk.f32.vlgmr.msra.gmra.mxu2 %vm229_vm0, %v437_v37  ;;  %648 = vmatpush.msra.mxu0 %v606_v41 }
  0xc1   : > { %802 = vmatmul.msk.f32.vlgmr.msra.gmra.mxu1 %vm229_vm0, %v437_v37  ;;  %808 = vmatmul.msk.f32.vlgmr.msrb.gmra.mxu3 %vm229_vm0, %v597_v42 }
  0xc2   : > { %805 = vmatmul.msk.f32.vlgmr.msrb.gmra.mxu0 %vm229_vm0, %v517_v43  ;;  %668 = vmatpush.msra.mxu1 %v603_v40 }
  0xc7   : > { %807 = vmatmul.msk.f32.vlgmr.msrb.gmra.mxu2 %vm229_vm0, %v517_v43 }
  0xc9   : > { %806 = vmatmul.msk.f32.vlgmr.msrb.gmra.mxu1 %vm229_vm0, %v517_v43 }
  0xca   : > { %809 = vmatmul.msk.f32.vlgmr.msra.gmra.mxu0 %vm229_vm0, %v597_v42 }
  0xd1   : > { %810 = vmatmul.msk.f32.vlgmr.msra.gmra.mxu1 %vm229_vm0, %v597_v42 }
 0x127   : > { %v250_v44 = vpop.f32.mrf.mxu0 }
 0x128   : > { %v314_v52 = vadd.f32 %v313_v45, %v250_v44 }
 0x12e   : > { %v270_v46 = vpop.f32.mrf.mxu1 }
 0x12f   : > { %v333_v47 = vpop.f32.mrf.mxu0 }
 0x130   : > { %v334_v57 = vadd.f32 %v333_v47, %v270_v46 }
 0x132   : > { %v290_v48 = vpop.f32.mrf.mxu2 }
 0x134   : > { %v410_v49 = vpop.f32.mrf.mxu3 }
 0x135   : > { %v434_v60 = vadd.f32 %v410_v49, %v334_v57 }
 0x136   : > { %v353_v50 = vpop.f32.mrf.mxu1 }
 0x137   : > { %v430_v51 = vpop.f32.mrf.mxu0  ;;  %v354_v62 = vadd.f32 %v353_v50, %v290_v48 }
 0x139   : > { %v435_v5 = vadd.f32 %v430_v51, %v354_v62 }
 0x13a   : > { %v390_v53 = vpop.f32.mrf.mxu2 }
 0x13b   : > { %v433_v54 = vadd.f32 %v390_v53, %v314_v52 }
 0x13c   : > { %v510_v55 = vpop.f32.mrf.mxu3 }
 0x13d   : > { %v515_v9 = vadd.f32 %v510_v55, %v435_v5 }
 0x13e   : > { %v470_v56 = vpop.f32.mrf.mxu1 }
 0x13f   : > { %v513_v58 = vadd.f32 %v470_v56, %v433_v54  ;;  %v550_v59 = vpop.f32.mrf.mxu0 }
 0x141   : > { %v593_v63 = vadd.f32 %v550_v59, %v513_v58 }
 0x142   : > { %v490_v61 = vpop.f32.mrf.mxu2 }
 0x143   : > { %v514_v0 = vadd.f32 %v490_v61, %v434_v60 }
 0x144   : > { %v630_v1 = vpop.f32.mrf.mxu3 }
 0x145   : > { %v673_v3 = vadd.f32 %v630_v1, %v593_v63 }
 0x146   : > { %v570_v4 = vpop.f32.mrf.mxu1 }
 0x147   : > { %v682_v6 = vadd.f32 %v680_v2, %v673_v3  ;;  %v594_v7 = vadd.f32 %v570_v4, %v514_v0  ;;  %v650_v8 = vpop.f32.mrf.mxu0 }
 0x149   : > { %685 = vst [vmem:[%s205_s25] sm:$0xff] %v682_v6  ;;  %v674_v10 = vadd.f32 %v650_v8, %v594_v7 }
 0x14a   : > { %v590_v11 = vpop.f32.mrf.mxu2 }
 0x14b   : > { %v683_v12 = vadd.f32 %v680_v2, %v674_v10  ;;  %v595_v13 = vadd.f32 %v590_v11, %v515_v9 }
 0x14d   : > { %686 = vst [vmem:[%s205_s25 + $0x8] sm:$0xff] %v683_v12 }
 0x14e   : > { %v670_v14 = vpop.f32.mrf.mxu1 }
 0x14f   : > { %v675_v15 = vadd.f32 %v670_v14, %v595_v13 }
 0x151   : > { %v684_v16 = vadd.f32 %v680_v2, %v675_v15 }
 0x153   : > { %688 = vst.msk [vmem:[%s205_s25 + $0x10] sm:$0xff] %vm687_vm6, %v684_v16 }
 0x154   : > { %998 = shalt.err (!%p995_p9)
}
 0x155   : > { %825 = dma.vmem_to_hbm [thread:$0]  (%p1132_p0), %s704_s9, 384, %s706_s7, %s690_s19  }
 0x156 PF: > { %s717_s5 = sand.u32 1, %s1029_s12   ;;  %p1248_p10 = scmp.ge.s32.totalorder %s1041_s15, 2 }
 0x157   : > { %s718_s21 = scalar_lea.sflag [#allocation4], %s717_s5 }
 0x158   : > { %p836_p11 = pnand %p1248_p10, %p1138_p6 }
 0x15a   : > { %p837_p12 = pneg %p836_p11 }
 0x15c   : > { %1024 = dma.done.wait (%p837_p12), %s718_s21, 384  }
 0x15d   : > { %1026 = vsyncadd (%p837_p12), %s718_s21, 4294966912  ;;  %p17_p2 = scmp.ge.s32.totalorder %s1112_s26, 4   ;;  %s1249_s12 = smov %s1033_s13 }
 0x15e   : > { %s1250_s13 = smov %s1037_s14  ;;  %s1251_s14 = smov %s1124_s29 }
 0x15f   : > { %s1252_s15 = smov %s1112_s26  ;;  %19 = sbr.rel (!%p17_p2) target bundleno = 6 (0x6), region = 86 }
 0x164   :  { %724 = vsyncpa [#allocation3], 1 }
 0x165   :  { %726 = vsyncpa [#allocation3 + $0x1], 1 }
 0x166   :  { %727 = vsyncpa [#allocation6], 1 }
 0x167   :  { %728 = vsyncpa [#allocation4], 1 }
 0x168   :  { %730 = vsyncpa [#allocation4 + $0x1], 1 }

</bundles_post_ra>
